<compile_context>
chip_gen: v5e
topology: v5e:2x2
jax: 0.10.0
libtpu: 0.0.40
codegen_flags: <defaults>
</compile_context>

<pallas_src>
import jax
import jax.numpy as jnp
from jax import lax
from jax.experimental import pallas as pl
from jax.experimental.pallas import tpu as pltpu


def _round_up(v, m):
    return (v + m - 1) // m * m


def _make_bce_dice_kernel(L, S, d, needs_mask):
    """Kernel over one (1, S, L) block of logits/targets -> one (1,1,32,128) tile."""
    nchunks = S // 8
    UNROLL = 8

    def kernel(x_ref, t_ref, out_ref):
        k = pl.program_id(1)

        def chunk_update(r0, carry):
            bce_a, int_a, ps_a, ts_a = carry
            x = x_ref[0, pl.ds(r0, 8), :].astype(jnp.float32)
            t = t_ref[0, pl.ds(r0, 8), :].astype(jnp.float32)

            # Shared transcendentals: one exp, one log, one reciprocal.
            e = jnp.exp(-jnp.abs(x))                  # exp(-|x|)
            softplus = jnp.log(1.0 + e)               # log(1 + exp(-|x|))
            # Numerically-stable BCE-with-logits (matches PyTorch):
            #   max(x, 0) - x*t + log(1 + exp(-|x|))
            bce_c = jnp.maximum(x, 0.0) - x * t + softplus
            r = pl.reciprocal(1.0 + e, approx=False)  # sigmoid(|x|)
            p = jnp.where(x >= 0.0, r, e * r)         # sigmoid(x)

            if needs_mask:
                # Zero contributions of padded / out-of-bounds elements by
                # global flat index (exact; pad/garbage values never matter).
                row = lax.broadcasted_iota(jnp.int32, (8, L), 0) + (k * S + r0)
                col = lax.broadcasted_iota(jnp.int32, (8, L), 1)
                valid = row * L + col < d
                bce_c = jnp.where(valid, bce_c, 0.0)
                p = jnp.where(valid, p, 0.0)
                t = jnp.where(valid, t, 0.0)

            return (bce_a + bce_c, int_a + p * t, ps_a + p, ts_a + t)

        zero = jnp.zeros((8, L), jnp.float32)
        carry = (zero, zero, zero, zero)

        n_outer = nchunks // UNROLL
        tail = nchunks % UNROLL

        if n_outer > 0:
            def outer(o, c):
                base = pl.multiple_of(o * (8 * UNROLL), 8)
                for u in range(UNROLL):
                    c = chunk_update(base + u * 8, c)
                return c
            carry = lax.fori_loop(0, n_outer, outer, carry)
        for u in range(tail):
            carry = chunk_update((n_outer * UNROLL + u) * 8, carry)

        def fold_lanes(a):              # (8, L) -> (8, 128); VPU adds only
            out = a[:, 0:128]
            for j in range(1, L // 128):
                out = out + a[:, 128 * j:128 * (j + 1)]
            return out

        bce_a, int_a, ps_a, ts_a = carry
        out_ref[0, 0, 0:8, :] = fold_lanes(bce_a)
        out_ref[0, 0, 8:16, :] = fold_lanes(int_a)
        out_ref[0, 0, 16:24, :] = fold_lanes(ps_a)
        out_ref[0, 0, 24:32, :] = fold_lanes(ts_a)

    return kernel


def bce_dice_loss(inp, target):
    """Pallas equivalent of BCEDiceLoss().forward(input, target). Returns scalar f32."""
    assert inp.shape == target.shape
    n = inp.shape[0]
    d = 1
    for s in inp.shape[1:]:
        d *= s

    x = inp.reshape(n, d)            # native dtype: no wrapper-side astype
    t = target.reshape(n, d)

    # ---- tile plan: view each sample as a lane-dense (R, L) slab -----------
    if d % 512 == 0 and d >= 512 * 64:
        L = 512                      # large D: wider lanes
    else:
        L = 128
    d_pad = max(_round_up(d, L), 8 * L)
    if d_pad != d:
        # Only triggers when D % L != 0 or D < 8*L (tiny samples). The pad
        # value is irrelevant: the in-kernel index mask zeros its contribution.
        x = jnp.pad(x, ((0, 0), (0, d_pad - d)))
        t = jnp.pad(t, ((0, 0), (0, d_pad - d)))
    R = d_pad // L
    S_target = 256 if L == 512 else 1024     # ~512 KiB f32 per input block
    S = min(S_target, (R // 8) * 8)          # multiple of 8, <= R
    K = pl.cdiv(R, S)
    needs_mask = (K * S * L) != d            # any padded / OOB coverage?

    x3 = x.reshape(n, R, L)
    t3 = t.reshape(n, R, L)

    kernel = _make_bce_dice_kernel(L, S, d, needs_mask)
    in_spec = pl.BlockSpec((1, S, L), lambda i, k: (i, k, 0))
    out = pl.pallas_call(
        kernel,
        out_shape=jax.ShapeDtypeStruct((n, K, 32, 128), jnp.float32),
        grid_spec=pltpu.PrefetchScalarGridSpec(
            num_scalar_prefetch=0,
            grid=(n, K),
            in_specs=[in_spec, in_spec],
            out_specs=pl.BlockSpec((1, 1, 32, 128), lambda i, k: (i, k, 0, 0)),
        ),
        compiler_params=pltpu.CompilerParams(
            # Every (i, k) step writes its own output tile -> both axes are
            # truly parallel (keeps both v7x TensorCores busy even for N=1).
            dimension_semantics=("parallel", "parallel"),
        ),
    )(x3, t3)

    # ---- tiny JAX epilogue --------------------------------------------------
    smooth = 1e-05
    parts = out.reshape(n, K, 4, 8, 128).sum(axis=(1, 3, 4))    # (n, 4)
    bce_sum, inter, psum, tsum = parts[:, 0], parts[:, 1], parts[:, 2], parts[:, 3]
    bce = jnp.sum(bce_sum) / jnp.float32(n * d)                 # mean over real elements
    dice_per = (2.0 * inter + smooth) / (psum + tsum + smooth)
    dice = 1.0 - jnp.sum(dice_per) / jnp.float32(n)
    return 0.5 * bce + dice


def _reference(inp, target):
    # Pure-JAX reference of the PyTorch forward.
    n = inp.shape[0]
    x = inp.reshape(n, -1).astype(jnp.float32)
    t = target.reshape(n, -1).astype(jnp.float32)
    bce_elem = jnp.maximum(x, 0.0) - x * t + jnp.log(1.0 + jnp.exp(-jnp.abs(x)))
    bce = jnp.mean(bce_elem)
    p = jax.nn.sigmoid(x)
    smooth = 1e-05
    dice = (2.0 * jnp.sum(p * t, 1) + smooth) / (jnp.sum(p, 1) + jnp.sum(t, 1) + smooth)
    dice = 1.0 - jnp.sum(dice) / n
    return 0.5 * bce + dice


if __name__ == "__main__":
    key = jax.random.PRNGKey(0)
    k1, k2, k3, k4, k5, k6 = jax.random.split(key, 6)

    # 1) NCHW f32: batch=2, channels=4, spatial=16x16 (D=1024 -> no pad, no mask).
    x = jax.random.normal(k1, (2, 4, 16, 16), dtype=jnp.float32)             # logits
    t = (jax.random.uniform(k2, (2, 4, 16, 16)) > 0.5).astype(jnp.float32)   # targets
    loss = bce_dice_loss(x, t)
    jax.block_until_ready(loss)
    ref = _reference(x, t)
    assert jnp.allclose(loss, ref, atol=1e-4, rtol=1e-4), (loss, ref)

    # 2) Native bf16 inputs (no wrapper-side upcast; kernel casts per chunk).
    loss_b = bce_dice_loss(x.astype(jnp.bfloat16), t.astype(jnp.bfloat16))
    ref_b = _reference(x.astype(jnp.bfloat16), t.astype(jnp.bfloat16))
    assert jnp.allclose(loss_b, ref_b, atol=1e-3, rtol=1e-3), (loss_b, ref_b)

    # 3) Ragged row count (D=5*16*16=1280 -> R=10, S=8, K=2): exercises the
    #    in-kernel tail mask on a partially out-of-bounds last block.
    x2 = jax.random.normal(k3, (2, 5, 16, 16), dtype=jnp.float32)
    t2 = (jax.random.uniform(k4, (2, 5, 16, 16)) > 0.5).astype(jnp.float32)
    loss2 = bce_dice_loss(x2, t2)
    ref2 = _reference(x2, t2)
    assert jnp.allclose(loss2, ref2, atol=1e-4, rtol=1e-4), (loss2, ref2)

    # 4) Larger D (16*32*32 = 16384 -> R=128, S=128): exercises the unrolled
    #    fori_loop chunk walk, with N=1.
    x4 = jax.random.normal(k5, (1, 16, 32, 32), dtype=jnp.float32)
    t4 = (jax.random.uniform(k6, (1, 16, 32, 32)) > 0.5).astype(jnp.float32)
    loss4 = bce_dice_loss(x4, t4)
    ref4 = _reference(x4, t4)
    assert jnp.allclose(loss4, ref4, atol=1e-4, rtol=1e-4), (loss4, ref4)

    print("KERNEL_OK")
</pallas_src>

<mosaic_0001>
module attributes {stable_mosaic.version = 11 : i64} {
  func.func @kernel(%arg0: i32, %arg1: i32, %arg2: memref<1x8x128xf32, #tpu.memory_space<vmem>>, %arg3: memref<1x8x128xf32, #tpu.memory_space<vmem>>, %arg4: memref<1x1x32x128xf32, #tpu.memory_space<vmem>>) attributes {dimension_semantics = [#tpu.dimension_semantics<parallel>, #tpu.dimension_semantics<parallel>], iteration_bounds = array<i64: 2, 1>, scalar_prefetch = 0 : i64, scratch_operands = 0 : i64, tpu.core_type = #tpu.core_type<tc>, window_params = [{transform_indices = @transform_0, window_bounds = array<i64: 1, 8, 128>}, {transform_indices = @transform_1, window_bounds = array<i64: 1, 8, 128>}, {transform_indices = @transform_2, window_bounds = array<i64: 1, 1, 32, 128>}]} {
    %cst = arith.constant 0.000000e+00 : f32
    %0 = vector.broadcast %cst : f32 to vector<8x128xf32>
    %c0 = arith.constant 0 : index
    %c0_0 = arith.constant 0 : index
    %c0_1 = arith.constant 0 : index
    %1 = vector.load %arg2[%c0, %c0_0, %c0_1] : memref<1x8x128xf32, #tpu.memory_space<vmem>>, vector<1x8x128xf32>
    %2 = vector.shape_cast %1 : vector<1x8x128xf32> to vector<8x128xf32>
    %c0_2 = arith.constant 0 : index
    %c0_3 = arith.constant 0 : index
    %c0_4 = arith.constant 0 : index
    %3 = vector.load %arg3[%c0_2, %c0_3, %c0_4] : memref<1x8x128xf32, #tpu.memory_space<vmem>>, vector<1x8x128xf32>
    %4 = vector.shape_cast %3 : vector<1x8x128xf32> to vector<8x128xf32>
    %5 = math.absf %2 : vector<8x128xf32>
    %cst_5 = arith.constant 0.000000e+00 : f32
    %6 = vector.broadcast %cst_5 : f32 to vector<8x128xf32>
    %7 = arith.subf %6, %5 : vector<8x128xf32>
    %8 = math.exp %7 : vector<8x128xf32>
    %cst_6 = arith.constant 1.000000e+00 : f32
    %9 = vector.broadcast %cst_6 : f32 to vector<8x128xf32>
    %10 = arith.addf %9, %8 : vector<8x128xf32>
    %11 = math.log %10 : vector<8x128xf32>
    %cst_7 = arith.constant 0.000000e+00 : f32
    %12 = vector.broadcast %cst_7 : f32 to vector<8x128xf32>
    %13 = arith.maximumf %2, %12 : vector<8x128xf32>
    %14 = arith.mulf %2, %4 : vector<8x128xf32>
    %15 = arith.subf %13, %14 : vector<8x128xf32>
    %16 = arith.addf %15, %11 : vector<8x128xf32>
    %cst_8 = arith.constant 1.000000e+00 : f32
    %17 = vector.broadcast %cst_8 : f32 to vector<8x128xf32>
    %18 = arith.addf %17, %8 : vector<8x128xf32>
    %19 = tpu.reciprocal %18 : vector<8x128xf32> -> vector<8x128xf32>
    %cst_9 = arith.constant 0.000000e+00 : f32
    %20 = vector.broadcast %cst_9 : f32 to vector<8x128xf32>
    %21 = arith.cmpf oge, %2, %20 : vector<8x128xf32>
    %22 = arith.mulf %8, %19 : vector<8x128xf32>
    %23 = arith.select %21, %19, %22 : vector<8x128xi1>, vector<8x128xf32>
    %24 = arith.addf %0, %16 : vector<8x128xf32>
    %25 = arith.mulf %23, %4 : vector<8x128xf32>
    %26 = arith.addf %0, %25 : vector<8x128xf32>
    %27 = arith.addf %0, %23 : vector<8x128xf32>
    %28 = arith.addf %0, %4 : vector<8x128xf32>
    %c0_10 = arith.constant 0 : index
    %c0_11 = arith.constant 0 : index
    %c0_12 = arith.constant 0 : index
    %c0_13 = arith.constant 0 : index
    %29 = vector.load %arg4[%c0_10, %c0_11, %c0_12, %c0_13] : memref<1x1x32x128xf32, #tpu.memory_space<vmem>>, vector<1x1x8x128xf32>
    %30 = vector.shape_cast %29 : vector<1x1x8x128xf32> to vector<8x128xf32>
    %31 = vector.shape_cast %24 : vector<8x128xf32> to vector<1x1x8x128xf32>
    tpu.vector_store %arg4[%c0_10, %c0_11, %c0_12, %c0_13], %31 {strides = array<i32>} : memref<1x1x32x128xf32, #tpu.memory_space<vmem>>, vector<1x1x8x128xf32>,
    %c0_14 = arith.constant 0 : index
    %c0_15 = arith.constant 0 : index
    %c8 = arith.constant 8 : index
    %c0_16 = arith.constant 0 : index
    %32 = vector.load %arg4[%c0_14, %c0_15, %c8, %c0_16] : memref<1x1x32x128xf32, #tpu.memory_space<vmem>>, vector<1x1x8x128xf32>
    %33 = vector.shape_cast %32 : vector<1x1x8x128xf32> to vector<8x128xf32>
    %34 = vector.shape_cast %26 : vector<8x128xf32> to vector<1x1x8x128xf32>
    tpu.vector_store %arg4[%c0_14, %c0_15, %c8, %c0_16], %34 {strides = array<i32>} : memref<1x1x32x128xf32, #tpu.memory_space<vmem>>, vector<1x1x8x128xf32>,
    %c0_17 = arith.constant 0 : index
    %c0_18 = arith.constant 0 : index
    %c16 = arith.constant 16 : index
    %c0_19 = arith.constant 0 : index
    %35 = vector.load %arg4[%c0_17, %c0_18, %c16, %c0_19] : memref<1x1x32x128xf32, #tpu.memory_space<vmem>>, vector<1x1x8x128xf32>
    %36 = vector.shape_cast %35 : vector<1x1x8x128xf32> to vector<8x128xf32>
    %37 = vector.shape_cast %27 : vector<8x128xf32> to vector<1x1x8x128xf32>
    tpu.vector_store %arg4[%c0_17, %c0_18, %c16, %c0_19], %37 {strides = array<i32>} : memref<1x1x32x128xf32, #tpu.memory_space<vmem>>, vector<1x1x8x128xf32>,
    %c0_20 = arith.constant 0 : index
    %c0_21 = arith.constant 0 : index
    %c24 = arith.constant 24 : index
    %c0_22 = arith.constant 0 : index
    %38 = vector.load %arg4[%c0_20, %c0_21, %c24, %c0_22] : memref<1x1x32x128xf32, #tpu.memory_space<vmem>>, vector<1x1x8x128xf32>
    %39 = vector.shape_cast %38 : vector<1x1x8x128xf32> to vector<8x128xf32>
    %40 = vector.shape_cast %28 : vector<8x128xf32> to vector<1x1x8x128xf32>
    tpu.vector_store %arg4[%c0_20, %c0_21, %c24, %c0_22], %40 {strides = array<i32>} : memref<1x1x32x128xf32, #tpu.memory_space<vmem>>, vector<1x1x8x128xf32>,
    return
  }
  func.func @transform_0(%arg0: i32, %arg1: i32) -> (i32, i32, i32) {
    %c0_i32 = arith.constant 0 : i32
    %c0_i32_0 = arith.constant 0 : i32
    return %arg0, %arg1, %c0_i32 : i32, i32, i32
  }
  func.func @transform_1(%arg0: i32, %arg1: i32) -> (i32, i32, i32) {
    %c0_i32 = arith.constant 0 : i32
    %c0_i32_0 = arith.constant 0 : i32
    return %arg0, %arg1, %c0_i32 : i32, i32, i32
  }
  func.func @transform_2(%arg0: i32, %arg1: i32) -> (i32, i32, i32, i32) {
    %c0_i32 = arith.constant 0 : i32
    %c0_i32_0 = arith.constant 0 : i32
    %c0_i32_1 = arith.constant 0 : i32
    return %arg0, %arg1, %c0_i32, %c0_i32_0 : i32, i32, i32, i32
  }
}

</mosaic_0001>

<bundles_post_ra>
// kernel: tpu_custom_call.1
= control target key start
LH: loop header
LB: loop body
LE: loop exit
PB: predicated region body
PF: predicated region fallthrough
CT: control target
= control target key end

     0   :  { %7 = vsyncpa [#allocation3], 0  ;;  %s780_s0 = inlined_call_operand.hbm [shape: f32[2,8,128], index: 0, kind: input, shape index: {}]   ;;  %s781_s1 = inlined_call_operand.hbm [shape: f32[2,8,128], index: 1, kind: input, shape index: {}]   ;;  %s782_s2 = inlined_call_operand.hbm [shape: f32[2,1,32,128], index: 2, kind: output, shape index: {}]  }
   0x1   :  { %9 = vsyncpa [#allocation3 + $0x1], 0 }
   0x2   :  { %10 = vsyncpa [#allocation6], 0 }
   0x3   :  { %12 = vsyncpa [#allocation6 + $0x1], 0 }
   0x4   :  { %13 = vsyncpa [#allocation4], 0 }
   0x5   :  { %15 = vsyncpa [#allocation4 + $0x1], 0  ;;  %s644_s9 = smov 0   ;;  %s646_s10 = smov 0  }
   0x6   :  { %s648_s11 = smov 0   ;;  %s650_s12 = smov 0  }
   0x7   :  { %s652_s13 = smov 0   ;;  %s654_s14 = smov 0  }
   0x8 LB: > { %s386_s15 = sadd.s32 4294967295, %s625_s14   ;;  %s387_s16 = sadd.s32 4294967294, %s625_s14   ;;  %s625_s14 = sphi %s654_s14, %s21_s14   ;;  %s621_s13 = sphi %s652_s13, %s791_s13   ;;  %s617_s12 = sphi %s650_s12, %s790_s12   ;;  %s613_s11 = sphi %s648_s11, %s789_s11   ;;  %s609_s10 = sphi %s646_s10, %s788_s10   ;;  %s605_s9 = sphi %s644_s9, %s787_s9  }
   0x9   : > { %s33_s17 = sadd.s32 1, %s621_s13  ;;  %s42_s18 = sadd.s32 1, %s613_s11 }
   0xa   : > { %p35_p0 = scmp.ge.s32.totalorder %s33_s17, 2  ;;  %p49_p1 = scmp.ne.s32.totalorder %s613_s11, %s609_s10 }
   0xb   : > { %p50_p2 = scmp.eq.s32.totalorder %s625_s14, 0  ;;  %p55_p3 = scmp.ne.s32.totalorder %s609_s10, %s605_s9 }
   0xc   : > { %s793_s17 = smov (%p35_p0, %s33_s17), 0  ;;  %p56_p5 = scmp.eq.s32.totalorder %s386_s15, 0 }
   0xd   : > { %p685_p4 = por %p50_p2, %p49_p1  ;;  %s37_s20 = ssub.s32 %s621_s13, %s793_s17 }
   0xe   : > { %p109_p6 = scmp.eq.s32.totalorder %s386_s15, 1  ;;  %p40_p7 = scmp.eq.s32.totalorder %s37_s20, 0 }
   0xf   : > { %p691_p8 = por %p56_p5, %p55_p3  ;;  %p115_p10 = scmp.eq.s32.totalorder %s387_s16, 1 }
  0x10   : > { %p695_p9 = por %p109_p6, %p49_p1  ;;  %p389_p12 = scmp.ge.s32.totalorder %s625_s14, 2 }
  0x11   : > { %s700_s23 = scalar_select %p40_p7, %s613_s11, %s42_s18  }
  0x12   : > { %p702_p11 = por %p115_p10, %p55_p3  ;;  %p421_p13 = scmp.lt.s32.totalorder %s625_s14, 2 }
  0x13   : > { %s135_s25 = sand.u32 1, %s613_s11   ;;  %s391_s27 = sshll.u32 %s621_s13, 3 }
  0x14   : > { %s390_s26 = sshll.u32 %s135_s25, 3  ;;  %s144_s30 = scalar_lea.hbm %s780_s0, %s391_s27 }
  0x15   : > { %s139_s3 = scalar_lea.vmem [#allocation2], %s390_s26  ;;  %s146_s5 = sshll.u32 %s144_s30, 4  ;;  %s147_s5 = int_to_ptr.hbm [resolvable:$true] %s146_s5 }
  0x16   : > { %s148_s4 = sshll.u32 %s139_s3, 4  ;;  %p411_p0 = pnand %p421_p13, %p685_p4  ;;  %s149_s4 = int_to_ptr.vmem [resolvable:$true] %s148_s4 }
  0x17   : > { %p394_p1 = scmp.ge.s32.totalorder %s625_s14, 1  ;;  %p173_p2 = scmp.lt.s32.totalorder %s625_s14, 3 }
  0x18   : > { %s136_s6 = scalar_lea.sflag [#allocation3], %s135_s25  ;;  %s164_s15 = scalar_lea.hbm %s781_s1, %s391_s27 }
  0x19   : > { %413 = dma.hbm_to_vmem [thread:$0]  (!%p411_p0), %s147_s5, 128, %s149_s4, %s136_s6  }
  0x1a   : > { %p174_p3 = pnand %p394_p1, %p173_p2  ;;  %s159_s16 = scalar_lea.vmem [#allocation5], %s390_s26 }
  0x1b   : > { %s168_s18 = sshll.u32 %s159_s16, 4  ;;  %s166_s20 = sshll.u32 %s164_s15, 4  ;;  %s169_s18 = int_to_ptr.vmem [resolvable:$true] %s168_s18  ;;  %s167_s20 = int_to_ptr.hbm [resolvable:$true] %s166_s20 }
  0x1c   : > { %s156_s28 = scalar_lea.sflag [#allocation6], %s135_s25  ;;  %177 = sbr.rel (%p174_p3) target bundleno = 79 (0x4f), region = 28 }
  0x1d   : > { %416 = dma.hbm_to_vmem [thread:$0]  (!%p411_p0), %s167_s20, 128, %s169_s18, %s156_s28  }
  0x1e   : > { %s721_s19 = sand.u32 (!%p174_p3), 1, %s609_s10  }
  0x1f   : > { %s395_s29 = sshll.u32 (!%p174_p3), %s721_s19, 3  ;;  %s180_s30 = scalar_lea.sflag (!%p174_p3), [#allocation3], %s721_s19 }
  0x20   : > { %s183_s3 = scalar_lea.vmem (!%p174_p3), [#allocation2], %s395_s29 }
  0x21   : > { %592 = dma.done.wait (%p691_p8), %s180_s30, 128  }
  0x22   : > { %594 = vsyncadd (%p691_p8), %s180_s30, 4294967168  ;;  %s190_s26 = scalar_lea.sflag [#allocation6], %s721_s19  ;;  %s193_s25 = scalar_lea.vmem [#allocation5], %s395_s29 }
  0x23   : > { %596 = dma.done.wait (%p691_p8), %s190_s26, 128  }
  0x24   : > { %598 = vsyncadd (%p691_p8), %s190_s26, 4294967168  ;;  %s397_s27 = sshll.u32 %s721_s19, 5  ;;  %v220_v0 = vld [vmem:[%s183_s3] sm:$0xff]  ;;  %v221_v1 = vld [vmem:[%s193_s25] sm:$0xff]  ;;  %s403_s21 = sshll.u32 %s617_s12, 5 }
  0x25   : > { %v222_v2 = vand.u32 2147483647, %v220_v0  ;;  %s735_s4 = scalar_lea.vmem [#allocation7], %s397_s27  ;;  %v229_v7 = vmax.f32 %v220_v0, 0.0  ;;  %v230_v8 = vmul.f32 %v221_v1, %v220_v0  ;;  %s273_s7 = scalar_lea.hbm %s782_s2, %s403_s21  ;;  %vm247_vm4 = vcmp.ge.f32.partialorder %v220_v0, 0.0 }
  0x26   : > { %258 = vst [vmem:[%s735_s4 + $0x18] sm:$0xff] %v221_v1  ;;  %s274_s8 = sshll.u32 %s735_s4, 4  ;;  %s276_s15 = sshll.u32 %s273_s7, 4  ;;  %s275_s8 = int_to_ptr.vmem [resolvable:$true] %s274_s8  ;;  %s277_s15 = int_to_ptr.hbm [resolvable:$true] %s276_s15 }
  0x27   : > { %v223_v3 = vsub.f32 0.0, %v222_v2  ;;  %v231_v9 = vsub.f32 %v229_v7, %v230_v8  ;;  %s260_s12 = scalar_lea.sflag [#allocation4], %s721_s19  ;;  %s553_s16 = sshra.s32 %s277_s15, 4  ;;  %s554_s16 = int_to_ptr.hbm [resolvable:$true] %s553_s16 }
  0x28   : > { %s555_s18 = scalar_lea.hbm %s554_s16, 32  ;;  %s559_s29 = scalar_lea.hbm %s782_s2, 64 }
  0x29   : > { %v224_v4 = vmul.f32 1.442695, %v223_v3  ;;  %p556_p4 = scmp.ne.s32.totalorder %s554_s16, %s555_s18  ;;  %p560_p7 = scmp.lt.s32.totalorder %s554_s16, %s782_s2 }
  0x2a   : > { %p561_p8 = scmp.lt.s32.totalorder %s559_s29, %s555_s18 }
  0x2b   : > { %473 = vpow2.f32 %v224_v4  ;;  %p557_p5 = pnand %p556_p4, %p695_p9 }
  0x2c   : > { %p562_p10 = por %p561_p8, %p560_p7 }
  0x2d   : > { %p558_p6 = pneg %p557_p5 }
  0x2f   : > { %p563_p13 = pnand %p562_p10, %p558_p6 }
  0x31   : > { %v474_v5 = vpop.eup %473 }
  0x32   : > { %v226_v6 = vadd.f32 1.0, %v474_v5 }
  0x34   : > { %475 = vlog2.f32 %v226_v6  ;;  %v244_v15 = vand.u32 2147483648, %v226_v6  ;;  %vm238_vm0 = vweird.f32 %v226_v6  ;;  %v242_v17 = vand.u32 2147483647, %v226_v6 }
  0x35   : > { %477 = vrcp.f32 %v226_v6 }
  0x36   : > { %v245_v19 = vor.u32 1.1754944e-38, %v244_v15  ;;  %vm243_vm3 = vcmp.eq.f32.partialorder %v242_v17, 8.507059e+37 }
  0x3a   : > { %v476_v10 = vpop.eup %475 }
  0x3b   : > { %v478_v11 = vpop.eup %477  ;;  %v228_v12 = vmul.f32 0.6931472, %v476_v10 }
  0x3c   : > { %v234_v13 = vmul.f32 %v478_v11, %v226_v6  ;;  %vm239_vm1 = vweird.f32 %v478_v11 }
  0x3d   : > { %v232_v14 = vadd.f32 %v231_v9, %v228_v12  ;;  %vm240_vm2 = vmor %vm238_vm0, %vm239_vm1 }
  0x3e   : > { %v235_v16 = vsub.f32 1.0, %v234_v13 }
  0x3f   : > { %255 = vst [vmem:[%s735_s4] sm:$0xff] %v232_v14 }
  0x40   : > { %v236_v18 = vmul.f32 %v478_v11, %v235_v16 }
  0x42   : > { %v237_v20 = vadd.f32 %v478_v11, %v236_v18 }
  0x44   : > { %v241_v21 = vsel %vm240_vm2, %v478_v11, %v237_v20 }
  0x45   : > { %v246_v22 = vsel %vm243_vm3, %v245_v19, %v241_v21 }
  0x46   : > { %v248_v23 = vmul.f32 %v474_v5, %v246_v22 }
  0x48   : > { %v249_v24 = vsel %vm247_vm4, %v246_v22, %v248_v23 }
  0x49   : > { %v251_v25 = vmul.f32 %v249_v24, %v221_v1  ;;  %257 = vst [vmem:[%s735_s4 + $0x10] sm:$0xff] %v249_v24 }
  0x4b   : > { %256 = vst [vmem:[%s735_s4 + $0x8] sm:$0xff] %v251_v25 }
  0x4c   : > { %566 = shalt.err (!%p563_p13)
}
  0x4d   : > { %s627_s19 = smov 128   ;;  %s628_s26 = smov 8  }
  0x4e   : > { %408 = dma.vmem_to_hbm [thread:$0]  (%p695_p9), %s275_s8, 512, %s277_s15, %s260_s12, %s627_s19, %s627_s19, %s628_s26  }
  0x4f PF: > { %s291_s25 = sand.u32 1, %s605_s9   ;;  %p418_p0 = pnand %p389_p12, %p702_p11 }
  0x50   : > { %s292_s27 = scalar_lea.sflag [#allocation4], %s291_s25 }
  0x51   : > { %p419_p1 = pneg %p418_p0 }
  0x53   : > { %600 = dma.done.wait (%p419_p1), %s292_s27, 512  }
  0x54   : > { %602 = vsyncadd (%p419_p1), %s292_s27, 4294966784  ;;  %s21_s14 = sadd.s32 1, %s625_s14   ;;  %s787_s9 = smov %s609_s10 }
  0x55   : > { %p18_p2 = scmp.ge.s32.totalorder %s21_s14, 4   ;;  %s788_s10 = smov %s613_s11 }
  0x56   : > { %s789_s11 = smov %s700_s23  ;;  %s790_s12 = smov %s621_s13 }
  0x57   : > { %s791_s13 = smov %s793_s17  ;;  %20 = sbr.rel (!%p18_p2) target bundleno = 8 (0x8), region = 86 }
  0x5c   :  { %298 = vsyncpa [#allocation3], 1 }
  0x5d   :  { %300 = vsyncpa [#allocation3 + $0x1], 1 }
  0x5e   :  { %301 = vsyncpa [#allocation6], 1 }
  0x5f   :  { %303 = vsyncpa [#allocation6 + $0x1], 1 }
  0x60   :  { %304 = vsyncpa [#allocation4], 1 }
  0x61   :  { %306 = vsyncpa [#allocation4 + $0x1], 1 }

</bundles_post_ra>
